<compile_context>
chip_gen: v6e
topology: v6e:2x2x1
jax: 0.10.0
libtpu: 0.0.40
codegen_flags: <defaults>
</compile_context>

<pallas_src>
import functools

import jax
import jax.numpy as jnp
from jax import lax
from jax.experimental import pallas as pl
from jax.experimental.pallas import tpu as pltpu


# ----------------------------------------------------------------------------
# helpers: block-size / padding / vmem budget
# ----------------------------------------------------------------------------
def _choose_block_rows(batch, row_bytes, target_bytes=4 << 20):
    """Rows per grid block so each input tile is ~target_bytes.

    Prefers a divisor of `batch` (so no HBM padding copy is needed); falls
    back to a sublane-friendly multiple of 8 with wrapper-side zero padding.
    """
    bt_cap = max(1, int(target_bytes) // max(int(row_bytes), 1))
    if bt_cap >= batch:
        return batch                       # single block == full batch

    # Largest divisor of batch that fits the VMEM target (trace-time loop).
    div = 1
    for d in range(min(bt_cap, batch), 0, -1):
        if batch % d == 0:
            div = d
            break
    if div >= max(8, bt_cap // 2):
        return div                         # big enough tile, zero padding cost

    return max(8, (bt_cap // 8) * 8)       # fallback: pad batch in the wrapper


def _pad_batch(x, bt):
    b = x.shape[0]
    pad = (-b) % bt
    if pad:
        x = jnp.pad(x, ((0, pad),) + ((0, 0),) * (x.ndim - 1))
    return x


def _vmem_limit(tile_bytes, n_inputs=2):
    # n_inputs x 2 pipeline buffers x tile + headroom, clamped to a safe range
    budget = n_inputs * 2 * tile_bytes + (8 << 20)
    return int(min(max(budget, 32 << 20), 48 << 20))


# ----------------------------------------------------------------------------
# Kernel 1: DistillKL partial sums
#   KL(softmax(o_t/T) || softmax(o_s/T)) summed over the block's rows.
#   Final * T^2 / B happens in the wrapper (B = true batch size).
# ----------------------------------------------------------------------------
def _kd_partial_kernel(os_ref, ot_ref, out_ref, *, temperature):
    inv_t = jnp.float32(1.0 / temperature)
    ls = os_ref[...].astype(jnp.float32) * inv_t         # (Bt, num_classes)
    lt = ot_ref[...].astype(jnp.float32) * inv_t

    ms = jnp.max(ls, axis=-1, keepdims=True)
    lse_s = ms + jnp.log(jnp.sum(jnp.exp(ls - ms), axis=-1, keepdims=True))
    log_ps = ls - lse_s                                   # log_softmax(o_s/T)

    mt = jnp.max(lt, axis=-1, keepdims=True)
    lse_t = mt + jnp.log(jnp.sum(jnp.exp(lt - mt), axis=-1, keepdims=True))
    log_pt = lt - lse_t                                   # log_softmax(o_t/T)
    pt = jnp.exp(log_pt)                                  # softmax(o_t/T)

    partial = jnp.sum(pt * (log_pt - log_ps))             # kl_div, sum-reduced
    out_ref[...] = jnp.broadcast_to(partial, out_ref.shape)


def kd_loss_pallas(o_s, o_t, temperature):
    batch, num_classes = o_s.shape
    itemsize = jnp.dtype(o_s.dtype).itemsize
    bt = _choose_block_rows(batch, num_classes * itemsize)

    o_s_p = _pad_batch(o_s, bt)
    o_t_p = _pad_batch(o_t, bt)
    nb = o_s_p.shape[0] // bt
    tile_bytes = bt * num_classes * itemsize

    partials = pl.pallas_call(
        functools.partial(_kd_partial_kernel, temperature=float(temperature)),
        out_shape=jax.ShapeDtypeStruct((nb, 128), jnp.float32),
        grid=(nb,),
        in_specs=[
            pl.BlockSpec((bt, num_classes), lambda b: (b, 0)),
            pl.BlockSpec((bt, num_classes), lambda b: (b, 0)),
        ],
        out_specs=pl.BlockSpec((1, 128), lambda b: (b, 0)),
        compiler_params=pltpu.CompilerParams(
            dimension_semantics=("parallel",),
            vmem_limit_bytes=_vmem_limit(tile_bytes),
        ),
    )(o_s_p, o_t_p)

    T = float(temperature)
    # Normalize by the TRUE batch size (zero-padded rows contribute exactly 0).
    return jnp.sum(partials[:, 0]) * (T * T) / batch


# ----------------------------------------------------------------------------
# Kernel 2: attention-transfer partial sums for one (f_s, f_t) feature pair.
#   at(f)   = l2_normalize( (f**2).mean(axis=1).reshape(B, -1) )   # [B, H*W]
#   at_loss = mean( (at(f_s) - at(f_t))**2 )
# Each block handles Bt full rows (all C channels, all H*W positions) and
# emits the block's sum of squared differences.
# ----------------------------------------------------------------------------
def _at_partial_kernel(fs_ref, ft_ref, out_ref):
    fs = fs_ref[...].astype(jnp.float32)                  # (Bt, C, HW)
    ft = ft_ref[...].astype(jnp.float32)

    a_s = jnp.mean(fs * fs, axis=1)                       # (Bt, HW) mean over C
    a_t = jnp.mean(ft * ft, axis=1)

    # F.normalize: x / max(||x||_2, eps), eps = 1e-12
    # == x * rsqrt(max(||x||^2, eps^2)); rsqrt runs on the EUP (free slot).
    eps2 = jnp.float32(1e-24)
    inv_ns = lax.rsqrt(jnp.maximum(jnp.sum(a_s * a_s, axis=-1, keepdims=True), eps2))
    inv_nt = lax.rsqrt(jnp.maximum(jnp.sum(a_t * a_t, axis=-1, keepdims=True), eps2))

    d = a_s * inv_ns - a_t * inv_nt
    partial = jnp.sum(d * d)                              # block SSE
    out_ref[...] = jnp.broadcast_to(partial, out_ref.shape)


def at_loss_pallas(f_s, f_t):
    # f_s, f_t: NCHW feature maps [B, C, H, W]
    B, C, H, W = f_s.shape
    hw = H * W
    itemsize = jnp.dtype(f_s.dtype).itemsize
    bt = _choose_block_rows(B, C * hw * itemsize)

    fs3 = _pad_batch(f_s.reshape(B, C, hw), bt)
    ft3 = _pad_batch(f_t.reshape(B, C, hw), bt)
    nb = fs3.shape[0] // bt
    tile_bytes = bt * C * hw * itemsize

    partials = pl.pallas_call(
        _at_partial_kernel,
        out_shape=jax.ShapeDtypeStruct((nb, 128), jnp.float32),
        grid=(nb,),
        in_specs=[
            pl.BlockSpec((bt, C, hw), lambda b: (b, 0, 0)),
            pl.BlockSpec((bt, C, hw), lambda b: (b, 0, 0)),
        ],
        out_specs=pl.BlockSpec((1, 128), lambda b: (b, 0)),
        compiler_params=pltpu.CompilerParams(
            dimension_semantics=("parallel",),
            vmem_limit_bytes=_vmem_limit(tile_bytes),
        ),
    )(fs3, ft3)

    # mean over all TRUE B*HW elements (padded rows contribute exactly 0)
    return jnp.sum(partials[:, 0]) / (B * hw)


# ----------------------------------------------------------------------------
# Full Attention module forward
# ----------------------------------------------------------------------------
def attention_forward(o_s, o_t, g_s, g_t, *, alpha, beta, temperature):
    loss = alpha * kd_loss_pallas(o_s, o_t, temperature)
    # NOTE: one pallas_call per feature pair (pairs have different C/H/W);
    # rows within each pair are batched into large blocks to amortize launch
    # and per-step overhead.
    at_sum = jnp.float32(0.0)
    for f_s, f_t in zip(g_s, g_t):
        at_sum = at_sum + at_loss_pallas(f_s, jax.lax.stop_gradient(f_t))
    return loss + beta * at_sum


# ----------------------------------------------------------------------------
# Pure-JAX reference for verification
# ----------------------------------------------------------------------------
def _ref_at(f):
    B = f.shape[0]
    a = jnp.mean(f.astype(jnp.float32) ** 2, axis=1).reshape(B, -1)
    n = jnp.sqrt(jnp.sum(a * a, axis=-1, keepdims=True))
    return a / jnp.maximum(n, 1e-12)


def _ref_forward(o_s, o_t, g_s, g_t, *, alpha, beta, temperature):
    T = temperature
    log_ps = jax.nn.log_softmax(o_s.astype(jnp.float32) / T, axis=1)
    log_pt = jax.nn.log_softmax(o_t.astype(jnp.float32) / T, axis=1)
    pt = jnp.exp(log_pt)
    kd = jnp.sum(pt * (log_pt - log_ps)) * (T * T) / o_s.shape[0]
    at = sum(jnp.mean((_ref_at(fs) - _ref_at(ft)) ** 2) for fs, ft in zip(g_s, g_t))
    return alpha * kd + beta * at


if __name__ == "__main__":
    # Hyperparameters (the module's args.alpha / args.beta / args.kd_T)
    ALPHA = 0.9
    BETA = 1000.0
    KD_T = 4.0

    key = jax.random.PRNGKey(0)
    k1, k2, k3, k4, k5, k6 = jax.random.split(key, 6)

    B, num_classes = 2, 16
    o_s = jax.random.normal(k1, (B, num_classes), dtype=jnp.float32)
    o_t = jax.random.normal(k2, (B, num_classes), dtype=jnp.float32)

    # two intermediate feature pairs (NCHW), different channel/spatial sizes
    g_s = [
        jax.random.normal(k3, (B, 4, 16, 16), dtype=jnp.float32),
        jax.random.normal(k4, (B, 8, 8, 8), dtype=jnp.float32),
    ]
    g_t = [
        jax.random.normal(k5, (B, 4, 16, 16), dtype=jnp.float32),
        jax.random.normal(k6, (B, 8, 8, 8), dtype=jnp.float32),
    ]

    loss = attention_forward(o_s, o_t, g_s, g_t,
                             alpha=ALPHA, beta=BETA, temperature=KD_T)
    loss = jax.block_until_ready(loss)

    ref = _ref_forward(o_s, o_t, g_s, g_t,
                       alpha=ALPHA, beta=BETA, temperature=KD_T)
    assert jnp.allclose(loss, ref, rtol=1e-4, atol=1e-4), (loss, ref)

    print("KERNEL_OK")
</pallas_src>

<mosaic_0001>
module attributes {stable_mosaic.version = 11 : i64} {
  func.func @_kd_partial_kernel(%arg0: i32, %arg1: memref<2x16xf32, #tpu.memory_space<vmem>>, %arg2: memref<2x16xf32, #tpu.memory_space<vmem>>, %arg3: memref<1x128xf32, #tpu.memory_space<vmem>>) attributes {dimension_semantics = [#tpu.dimension_semantics<parallel>], iteration_bounds = array<i64: 1>, scalar_prefetch = 0 : i64, scratch_operands = 0 : i64, tpu.core_type = #tpu.core_type<tc>, window_params = [{transform_indices = @transform_0, window_bounds = array<i64: 2, 16>}, {transform_indices = @transform_1, window_bounds = array<i64: 2, 16>}, {transform_indices = @transform_2, window_bounds = array<i64: 1, 128>}]} {
    %c0 = arith.constant 0 : index
    %c0_0 = arith.constant 0 : index
    %0 = vector.load %arg1[%c0, %c0_0] : memref<2x16xf32, #tpu.memory_space<vmem>>, vector<2x16xf32>
    %cst = arith.constant 2.500000e-01 : f32
    %1 = vector.broadcast %cst : f32 to vector<2x16xf32>
    %2 = arith.mulf %0, %1 : vector<2x16xf32>
    %c0_1 = arith.constant 0 : index
    %c0_2 = arith.constant 0 : index
    %3 = vector.load %arg2[%c0_1, %c0_2] : memref<2x16xf32, #tpu.memory_space<vmem>>, vector<2x16xf32>
    %cst_3 = arith.constant 2.500000e-01 : f32
    %4 = vector.broadcast %cst_3 : f32 to vector<2x16xf32>
    %5 = arith.mulf %3, %4 : vector<2x16xf32>
    %cst_4 = arith.constant dense<0xFF800000> : vector<2xf32>
    %6 = vector.multi_reduction <maximumf>, %2, %cst_4 [1] : vector<2x16xf32> to vector<2xf32>
    %7 = vector.shape_cast %6 : vector<2xf32> to vector<2x1xf32>
    %8 = vector.broadcast %7 : vector<2x1xf32> to vector<2x16xf32>
    %9 = arith.subf %2, %8 : vector<2x16xf32>
    %10 = math.exp %9 : vector<2x16xf32>
    %cst_5 = arith.constant dense<0.000000e+00> : vector<2xf32>
    %11 = vector.multi_reduction <add>, %10, %cst_5 [1] : vector<2x16xf32> to vector<2xf32>
    %12 = vector.shape_cast %11 : vector<2xf32> to vector<2x1xf32>
    %13 = math.log %12 : vector<2x1xf32>
    %14 = arith.addf %7, %13 : vector<2x1xf32>
    %15 = vector.broadcast %14 : vector<2x1xf32> to vector<2x16xf32>
    %16 = arith.subf %2, %15 : vector<2x16xf32>
    %cst_6 = arith.constant dense<0xFF800000> : vector<2xf32>
    %17 = vector.multi_reduction <maximumf>, %5, %cst_6 [1] : vector<2x16xf32> to vector<2xf32>
    %18 = vector.shape_cast %17 : vector<2xf32> to vector<2x1xf32>
    %19 = vector.broadcast %18 : vector<2x1xf32> to vector<2x16xf32>
    %20 = arith.subf %5, %19 : vector<2x16xf32>
    %21 = math.exp %20 : vector<2x16xf32>
    %cst_7 = arith.constant dense<0.000000e+00> : vector<2xf32>
    %22 = vector.multi_reduction <add>, %21, %cst_7 [1] : vector<2x16xf32> to vector<2xf32>
    %23 = vector.shape_cast %22 : vector<2xf32> to vector<2x1xf32>
    %24 = math.log %23 : vector<2x1xf32>
    %25 = arith.addf %18, %24 : vector<2x1xf32>
    %26 = vector.broadcast %25 : vector<2x1xf32> to vector<2x16xf32>
    %27 = arith.subf %5, %26 : vector<2x16xf32>
    %28 = math.exp %27 : vector<2x16xf32>
    %29 = arith.subf %27, %16 : vector<2x16xf32>
    %30 = arith.mulf %28, %29 : vector<2x16xf32>
    %31 = vector.shape_cast %30 : vector<2x16xf32> to vector<1x2x16xf32>
    %cst_8 = arith.constant dense<0.000000e+00> : vector<1xf32>
    %32 = vector.multi_reduction <add>, %31, %cst_8 [1, 2] : vector<1x2x16xf32> to vector<1xf32>
    %33 = vector.shape_cast %32 : vector<1xf32> to vector<1x1x1xf32>
    %34 = vector.extract %33[0, 0, 0] : f32 from vector<1x1x1xf32>
    %35 = vector.broadcast %34 : f32 to vector<1x128xf32>
    %c0_9 = arith.constant 0 : index
    %c0_10 = arith.constant 0 : index
    %36 = vector.load %arg3[%c0_9, %c0_10] : memref<1x128xf32, #tpu.memory_space<vmem>>, vector<1x128xf32>
    tpu.vector_store %arg3[%c0_9, %c0_10], %35 {strides = array<i32>} : memref<1x128xf32, #tpu.memory_space<vmem>>, vector<1x128xf32>,
    return
  }
  func.func @transform_0(%arg0: i32) -> (i32, i32) {
    %c0_i32 = arith.constant 0 : i32
    %c0_i32_0 = arith.constant 0 : i32
    return %arg0, %c0_i32 : i32, i32
  }
  func.func @transform_1(%arg0: i32) -> (i32, i32) {
    %c0_i32 = arith.constant 0 : i32
    %c0_i32_0 = arith.constant 0 : i32
    return %arg0, %c0_i32 : i32, i32
  }
  func.func @transform_2(%arg0: i32) -> (i32, i32) {
    %c0_i32 = arith.constant 0 : i32
    %c0_i32_0 = arith.constant 0 : i32
    return %arg0, %c0_i32 : i32, i32
  }
}

</mosaic_0001>

<bundles_post_ra>
// kernel: tpu_custom_call.1
= control target key start
LH: loop header
LB: loop body
LE: loop exit
PB: predicated region body
PF: predicated region fallthrough
CT: control target
= control target key end

     0   :  { %7 = vsyncpa [#allocation3], 0  ;;  %s212_s0 = inlined_call_operand.hbm [shape: f32[2,16], index: 0, kind: input, shape index: {}]   ;;  %s213_s1 = inlined_call_operand.hbm [shape: f32[2,16], index: 1, kind: input, shape index: {}]   ;;  %s214_s2 = inlined_call_operand.hbm [shape: f32[1,128], index: 2, kind: output, shape index: {}]  }
   0x1   :  { %8 = vsyncpa [#allocation6], 0 }
   0x2   :  { %9 = vsyncpa [#allocation4], 0  ;;  %s180_s9 = smov [#allocation2]   ;;  %s181_s11 = smov [#allocation5]  }
   0x3   :  { %s16_s10 = sshll.u32 %s180_s9, 4  ;;  %s26_s12 = sshll.u32 %s181_s11, 4  ;;  %s17_s10 = int_to_ptr.vmem [resolvable:$true] %s16_s10  ;;  %s27_s12 = int_to_ptr.vmem [resolvable:$true] %s26_s12 }
   0x4   :  { %s122_s13 = scalar_lea.vmem %s17_s10, 32  ;;  %p127_p1 = scmp.lt.s32.totalorder %s17_s10, %s17_s10 }
   0x5   :  { %p123_p0 = scmp.ne.s32.totalorder %s17_s10, %s122_s13  ;;  %p128_p2 = scmp.lt.s32.totalorder %s122_s13, %s122_s13 }
   0x7   :  { %p129_p3 = por %p128_p2, %p127_p1 }
   0x9   :  { %p130_p4 = pnand %p129_p3, %p123_p0 }
   0xb   :  { %133 = shalt.err (!%p130_p4)
}
   0xc   :  { %19 = dma.hbm_to_vmem [thread:$0]  %s212_s0, 32, %s17_s10, [#allocation3]  }
   0xd   :  { %s142_s16 = scalar_lea.vmem %s27_s12, 32  ;;  %p147_p6 = scmp.lt.s32.totalorder %s27_s12, %s27_s12 }
   0xe   :  { %p143_p5 = scmp.ne.s32.totalorder %s27_s12, %s142_s16  ;;  %p148_p7 = scmp.lt.s32.totalorder %s142_s16, %s142_s16 }
  0x10   :  { %p149_p8 = por %p148_p7, %p147_p6 }
  0x12   :  { %p150_p9 = pnand %p149_p8, %p143_p5 }
  0x14   :  { %153 = shalt.err (!%p150_p9)
}
  0x15   :  { %29 = dma.hbm_to_vmem [thread:$0]  %s213_s1, 32, %s27_s12, [#allocation6]  }
  0x16   :  { %174 = dma.done.wait [#allocation3], 32  }
  0x17   :  { %175 = vsyncadd [#allocation3], 4294967264 }
  0x18   :  { %176 = dma.done.wait [#allocation6], 32  }
  0x19   :  { %177 = vsyncadd [#allocation6], 4294967264  ;;  %v38_v0 = vld [vmem:[#allocation5] sm:$0x3]  ;;  %vm40_vm0 = vcmask 123904   ;;  %s182_s0 = smov [#allocation7]  }
  0x1a   :  { %v36_v1 = vld [vmem:[#allocation2] sm:$0x3]  ;;  %v39_v2 = vmul.f32 0.25, %v38_v0  ;;  %s89_s1 = sshll.u32 %s182_s0, 4  ;;  %s90_s1 = int_to_ptr.vmem [resolvable:$true] %s89_s1 }
  0x1b   :  { %v37_v3 = vmul.f32 0.25, %v36_v1  ;;  %s154_s20 = scalar_lea.vmem %s90_s1, 16  ;;  %s158_s21 = scalar_lea.vmem %s90_s1, 32 }
  0x1c   :  { %v54_v4 = vsel %vm40_vm0, %v39_v2, -inf  ;;  %p155_p10 = scmp.ne.s32.totalorder %s90_s1, %s154_s20  ;;  %p159_p11 = scmp.lt.s32.totalorder %s90_s1, %s90_s1 }
  0x1d   :  { %55 = vmax.xlane.f32.xlu0 %v54_v4  ;;  %v41_v5 = vsel %vm40_vm0, %v37_v3, -inf  ;;  %p160_p12 = scmp.lt.s32.totalorder %s158_s21, %s154_s20 }
  0x1f   :  { %p161_p13 = por %p160_p12, %p159_p11 }
  0x21   :  { %42 = vmax.xlane.f32.xlu0 %v41_v5  ;;  %p162_p0 = pnand %p161_p13, %p155_p10 }
  0xa6   :  { %v56_v6 = vpop.xlane.xlu0 %55 }
  0xa7   :  { %v57_v7 = vsub.f32 %v39_v2, %v56_v6 }
  0xa9   :  { %v58_v8 = vmul.f32 1.442695, %v57_v7 }
  0xaa   :  { %v43_v9 = vpop.xlane.xlu0 %42 }
  0xab   :  { %104 = vpow2.f32 %v58_v8  ;;  %v44_v10 = vsub.f32 %v37_v3, %v43_v9 }
  0xad   :  { %v45_v11 = vmul.f32 1.442695, %v44_v10 }
  0xaf   :  { %106 = vpow2.f32 %v45_v11 }
  0xb8   :  { %v105_v12 = vpop.eup %104 }
  0xb9   :  { %v60_v13 = vsel %vm40_vm0, %v105_v12, 0.0 }
  0xba   :  { %61 = vadd.xlane.f32.xlu1 %v60_v13 }
  0xbc   :  { %v107_v14 = vpop.eup %106 }
  0xbd   :  { %v47_v15 = vsel %vm40_vm0, %v107_v14, 0.0 }
  0xbe   :  { %48 = vadd.xlane.f32.xlu1 %v47_v15 }
 0x143   :  { %v62_v16 = vpop.xlane.xlu1 %61 }
 0x144   :  { %108 = vlog2.f32 %v62_v16 }
 0x147   :  { %v49_v17 = vpop.xlane.xlu1 %48 }
 0x148   :  { %110 = vlog2.f32 %v49_v17 }
 0x151   :  { %v109_v18 = vpop.eup %108 }
 0x152   :  { %v64_v19 = vmul.f32 0.6931472, %v109_v18 }
 0x154   :  { %v65_v20 = vadd.f32 %v64_v19, %v56_v6 }
 0x155   :  { %v111_v22 = vpop.eup %110 }
 0x156   :  { %v66_v21 = vsub.f32 %v39_v2, %v65_v20  ;;  %v51_v24 = vmul.f32 0.6931472, %v111_v22 }
 0x158   :  { %v67_v23 = vmul.f32 1.442695, %v66_v21  ;;  %v52_v25 = vadd.f32 %v51_v24, %v43_v9 }
 0x15a   :  { %112 = vpow2.f32 %v67_v23  ;;  %v53_v26 = vsub.f32 %v37_v3, %v52_v25 }
 0x15c   :  { %v69_v27 = vsub.f32 %v66_v21, %v53_v26 }
 0x167   :  { %v113_v28 = vpop.eup %112 }
 0x168   :  { %v70_v29 = vmul.f32 %v113_v28, %v69_v27 }
 0x16a   :  { %v71_v30 = vsel %vm40_vm0, %v70_v29, 0.0 }
 0x16b   :  { %72 = vadd.xlane.f32.xlu0 %v71_v30 }
 0x1f4   :  { %v73_v31 = vpop.xlane.xlu0 %72 }
 0x1f5   :  { %v74_v32 = vrot.slane %v73_v31, 4 }
 0x1f7   :  { %v75_v33 = vadd.f32 %v74_v32, %v73_v31 }
 0x1f9   :  { %v76_v34 = vrot.slane %v75_v33, 2 }
 0x1fb   :  { %v77_v35 = vadd.f32 %v76_v34, %v75_v33 }
 0x1fd   :  { %v78_v36 = vrot.slane %v77_v35, 1 }
 0x1ff   :  { %v79_v37 = vadd.f32 %v78_v36, %v77_v35 }
 0x201   :  { %99 = vpush %v79_v37 }
 0x232   :  { %s100_s19 = spop %99 }
 0x233   :  { %v81_v38 = vstv %s100_s19 }
 0x234   :  { %82 = vst [vmem:[#allocation7] sm:$0x1] %v81_v38 }
 0x235   :  { %165 = shalt.err (!%p162_p0)
}
 0x236   :  { %92 = dma.vmem_to_hbm [thread:$0]  %s90_s1, 16, %s214_s2, [#allocation4]  }
 0x237   :  { %178 = dma.done.wait [#allocation4], 16  }
 0x238   :  { %179 = vsyncadd [#allocation4], 4294967280 }
 0x239   :  { %96 = vsyncpa [#allocation3], 1 }
 0x23a   :  { %97 = vsyncpa [#allocation6], 1 }
 0x23b   :  { %98 = vsyncpa [#allocation4], 1 }

</bundles_post_ra>
